<compile_context>
chip_gen: v7x
topology: tpu7x:2x2x1
jax: 0.10.0
libtpu: 0.0.40
codegen_flags: <defaults>
</compile_context>

<pallas_src>
import functools

import jax
import jax.numpy as jnp
from jax import lax
from jax.experimental import pallas as pl
from jax.experimental.pallas import tpu as pltpu

_TARGET_BLOCK_ELEMS = 256 * 1024  # ~1 MiB of f32 per block


# ------------------------- pass 1: global min / max / mean ------------------
def _reduce_kernel(x_ref, mean_out, mn_out, mx_out,
                   mn_acc, mx_acc, sum_acc,
                   *, n_valid, tile_rows, last, need_mask):
    i = pl.program_id(0)

    @pl.when(i == 0)
    def _():
        mn_acc[...] = jnp.full(mn_acc.shape, jnp.inf, jnp.float32)
        mx_acc[...] = jnp.full(mx_acc.shape, -jnp.inf, jnp.float32)
        sum_acc[...] = jnp.zeros(sum_acc.shape, jnp.float32)

    tile = x_ref[...].astype(jnp.float32)
    if need_mask:
        # Exclude padding / overhanging rows by flat element index.
        row_ids = i * tile_rows + lax.broadcasted_iota(jnp.int32, tile.shape, 0)
        col_ids = lax.broadcasted_iota(jnp.int32, tile.shape, 1)
        valid = row_ids * last + col_ids < n_valid
        tile_mn = jnp.where(valid, tile, jnp.inf)
        tile_mx = jnp.where(valid, tile, -jnp.inf)
        tile_sm = jnp.where(valid, tile, 0.0)
    else:
        tile_mn = tile_mx = tile_sm = tile

    # Elementwise folds only (VPU) per step; no per-step XLU reduce / SMEM trip.
    mn_acc[...] = jnp.minimum(mn_acc[...], tile_mn)
    mx_acc[...] = jnp.maximum(mx_acc[...], tile_mx)
    sum_acc[...] = sum_acc[...] + tile_sm

    @pl.when(i == pl.num_programs(0) - 1)
    def _():
        mn_out[0] = jnp.min(mn_acc[...])
        mx_out[0] = jnp.max(mx_acc[...])
        mean_out[0] = jnp.sum(sum_acc[...]) / jnp.float32(n_valid)


# ------------------------- pass 2: elementwise normalize --------------------
def _normalize_kernel(mean_ref, mn_ref, mx_ref, x_ref, o_ref):
    mean = mean_ref[0]
    inv = 1.0 / (mx_ref[0] - mn_ref[0])  # scalar; cost irrelevant to roofline
    o_ref[...] = ((x_ref[...].astype(jnp.float32) - mean) * inv).astype(o_ref.dtype)


def mean_norm(x: jax.Array) -> jax.Array:
    """Pallas implementation of MeanNorm.forward."""
    orig_shape = x.shape
    in_dtype = x.dtype
    out_dtype = in_dtype if jnp.issubdtype(in_dtype, jnp.floating) else jnp.float32

    n = x.size
    xf = x.reshape(-1)

    # Pick a lane-dense 2D view whose last dim is a large multiple of 128.
    last = None
    for cand in (2048, 1024, 512, 256, 128):
        if n % cand == 0:
            last = cand
            break

    padded = False
    if last is None:
        # Ragged fallback: zero-pad; padding is masked out inside the kernel.
        last = 1024
        n_pad = (-n) % last
        xf = jnp.concatenate([xf, jnp.zeros((n_pad,), dtype=in_dtype)])
        padded = True

    rows = xf.shape[0] // last
    x2d = xf.reshape(rows, last)

    tr = _TARGET_BLOCK_ELEMS // last
    if tr >= rows:
        tile_rows = rows                          # single block in the row dim
    else:
        tile_rows = max(32, (tr // 32) * 32)      # sublane-safe for any dtype
    num_tiles = pl.cdiv(rows, tile_rows)
    need_mask = (num_tiles * tile_rows * last) != n

    reduce_kernel = functools.partial(
        _reduce_kernel, n_valid=n, tile_rows=tile_rows, last=last,
        need_mask=need_mask)

    # --- pass 1: global mean / min / max (sequential reduction over grid) ---
    mean, mn, mx = pl.pallas_call(
        reduce_kernel,
        out_shape=(
            jax.ShapeDtypeStruct((1,), jnp.float32),
            jax.ShapeDtypeStruct((1,), jnp.float32),
            jax.ShapeDtypeStruct((1,), jnp.float32),
        ),
        grid_spec=pltpu.PrefetchScalarGridSpec(
            num_scalar_prefetch=0,
            grid=(num_tiles,),
            in_specs=[pl.BlockSpec((tile_rows, last), lambda i: (i, 0))],
            out_specs=(
                pl.BlockSpec(memory_space=pltpu.SMEM),
                pl.BlockSpec(memory_space=pltpu.SMEM),
                pl.BlockSpec(memory_space=pltpu.SMEM),
            ),
            scratch_shapes=[
                pltpu.VMEM((tile_rows, last), jnp.float32),
                pltpu.VMEM((tile_rows, last), jnp.float32),
                pltpu.VMEM((tile_rows, last), jnp.float32),
            ],
        ),
        compiler_params=pltpu.CompilerParams(
            dimension_semantics=("arbitrary",)),
    )(x2d)

    # --- pass 2: elementwise (x - mean) / (max - min), original dtype I/O ---
    y2d = pl.pallas_call(
        _normalize_kernel,
        out_shape=jax.ShapeDtypeStruct((rows, last), out_dtype),
        grid_spec=pltpu.PrefetchScalarGridSpec(
            num_scalar_prefetch=0,
            grid=(num_tiles,),
            in_specs=[
                pl.BlockSpec(memory_space=pltpu.SMEM),
                pl.BlockSpec(memory_space=pltpu.SMEM),
                pl.BlockSpec(memory_space=pltpu.SMEM),
                pl.BlockSpec((tile_rows, last), lambda i: (i, 0)),
            ],
            out_specs=pl.BlockSpec((tile_rows, last), lambda i: (i, 0)),
        ),
        compiler_params=pltpu.CompilerParams(
            dimension_semantics=("parallel",)),
    )(mean, mn, mx, x2d)

    if padded:
        return y2d.reshape(-1)[:n].reshape(orig_shape)
    return y2d.reshape(orig_shape)


if __name__ == "__main__":
    key = jax.random.PRNGKey(0)
    # NCHW-style input, as the dataset transform would see.
    x = jax.random.normal(key, (2, 4, 16, 16), dtype=jnp.float32) * 3.0 + 1.5

    out = jax.block_until_ready(mean_norm(x))

    # Reference check (pure JAX, same math as the PyTorch MeanNorm module).
    ref = (x - jnp.mean(x)) / (jnp.max(x) - jnp.min(x))
    assert out.shape == x.shape
    assert out.dtype == x.dtype
    assert jnp.allclose(out, ref, atol=1e-5, rtol=1e-5), "mismatch vs reference"

    # Also exercise the ragged / non-128-divisible fallback path.
    x2 = jax.random.normal(jax.random.PRNGKey(1), (3, 5, 7), dtype=jnp.float32)
    out2 = jax.block_until_ready(mean_norm(x2))
    ref2 = (x2 - jnp.mean(x2)) / (jnp.max(x2) - jnp.min(x2))
    assert jnp.allclose(out2, ref2, atol=1e-5, rtol=1e-5), "mismatch (ragged path)"

    print("KERNEL_OK")
</pallas_src>

<mosaic_0001>
module attributes {stable_mosaic.version = 11 : i64} {
  func.func @_reduce_kernel(%arg0: i32, %arg1: memref<1x2048xf32, #tpu.memory_space<vmem>>, %arg2: memref<1xf32, #tpu.memory_space<smem>>, %arg3: memref<1xf32, #tpu.memory_space<smem>>, %arg4: memref<1xf32, #tpu.memory_space<smem>>, %arg5: memref<1x2048xf32, #tpu.memory_space<vmem>>, %arg6: memref<1x2048xf32, #tpu.memory_space<vmem>>, %arg7: memref<1x2048xf32, #tpu.memory_space<vmem>>) attributes {dimension_semantics = [#tpu.dimension_semantics<arbitrary>], iteration_bounds = array<i64: 1>, scalar_prefetch = 0 : i64, scratch_operands = 3 : i64, tpu.core_type = #tpu.core_type<tc>, window_params = [{transform_indices = @transform_0, window_bounds = array<i64: 1, 2048>}, {transform_indices = @transform_1, window_bounds = array<i64: 1>}, {transform_indices = @transform_2, window_bounds = array<i64: 1>}, {transform_indices = @transform_3, window_bounds = array<i64: 1>}]} {
    %c0_i32 = arith.constant 0 : i32
    %0 = arith.cmpi eq, %arg0, %c0_i32 : i32
    %1 = arith.extui %0 : i1 to i32
    %c0_i32_0 = arith.constant 0 : i32
    %2 = arith.cmpi ne, %1, %c0_i32_0 : i32
    scf.if %2 {
      %cst = arith.constant 0x7F800000 : f32
      %16 = vector.broadcast %cst : f32 to vector<1x2048xf32>
      %c0_16 = arith.constant 0 : index
      %c0_17 = arith.constant 0 : index
      %17 = vector.load %arg5[%c0_16, %c0_17] : memref<1x2048xf32, #tpu.memory_space<vmem>>, vector<1x2048xf32>
      tpu.vector_store %arg5[%c0_16, %c0_17], %16 {strides = array<i32>} : memref<1x2048xf32, #tpu.memory_space<vmem>>, vector<1x2048xf32>,
      %cst_18 = arith.constant 0xFF800000 : f32
      %18 = vector.broadcast %cst_18 : f32 to vector<1x2048xf32>
      %c0_19 = arith.constant 0 : index
      %c0_20 = arith.constant 0 : index
      %19 = vector.load %arg6[%c0_19, %c0_20] : memref<1x2048xf32, #tpu.memory_space<vmem>>, vector<1x2048xf32>
      tpu.vector_store %arg6[%c0_19, %c0_20], %18 {strides = array<i32>} : memref<1x2048xf32, #tpu.memory_space<vmem>>, vector<1x2048xf32>,
      %cst_21 = arith.constant 0.000000e+00 : f32
      %20 = vector.broadcast %cst_21 : f32 to vector<1x2048xf32>
      %c0_22 = arith.constant 0 : index
      %c0_23 = arith.constant 0 : index
      %21 = vector.load %arg7[%c0_22, %c0_23] : memref<1x2048xf32, #tpu.memory_space<vmem>>, vector<1x2048xf32>
      tpu.vector_store %arg7[%c0_22, %c0_23], %20 {strides = array<i32>} : memref<1x2048xf32, #tpu.memory_space<vmem>>, vector<1x2048xf32>,
    } else {
    }
    %c0 = arith.constant 0 : index
    %c0_1 = arith.constant 0 : index
    %3 = vector.load %arg1[%c0, %c0_1] : memref<1x2048xf32, #tpu.memory_space<vmem>>, vector<1x2048xf32>
    %c0_2 = arith.constant 0 : index
    %c0_3 = arith.constant 0 : index
    %4 = vector.load %arg5[%c0_2, %c0_3] : memref<1x2048xf32, #tpu.memory_space<vmem>>, vector<1x2048xf32>
    %5 = arith.minimumf %4, %3 : vector<1x2048xf32>
    %c0_4 = arith.constant 0 : index
    %c0_5 = arith.constant 0 : index
    %6 = vector.load %arg5[%c0_4, %c0_5] : memref<1x2048xf32, #tpu.memory_space<vmem>>, vector<1x2048xf32>
    tpu.vector_store %arg5[%c0_4, %c0_5], %5 {strides = array<i32>} : memref<1x2048xf32, #tpu.memory_space<vmem>>, vector<1x2048xf32>,
    %c0_6 = arith.constant 0 : index
    %c0_7 = arith.constant 0 : index
    %7 = vector.load %arg6[%c0_6, %c0_7] : memref<1x2048xf32, #tpu.memory_space<vmem>>, vector<1x2048xf32>
    %8 = arith.maximumf %7, %3 : vector<1x2048xf32>
    %c0_8 = arith.constant 0 : index
    %c0_9 = arith.constant 0 : index
    %9 = vector.load %arg6[%c0_8, %c0_9] : memref<1x2048xf32, #tpu.memory_space<vmem>>, vector<1x2048xf32>
    tpu.vector_store %arg6[%c0_8, %c0_9], %8 {strides = array<i32>} : memref<1x2048xf32, #tpu.memory_space<vmem>>, vector<1x2048xf32>,
    %c0_10 = arith.constant 0 : index
    %c0_11 = arith.constant 0 : index
    %10 = vector.load %arg7[%c0_10, %c0_11] : memref<1x2048xf32, #tpu.memory_space<vmem>>, vector<1x2048xf32>
    %11 = arith.addf %10, %3 : vector<1x2048xf32>
    %c0_12 = arith.constant 0 : index
    %c0_13 = arith.constant 0 : index
    %12 = vector.load %arg7[%c0_12, %c0_13] : memref<1x2048xf32, #tpu.memory_space<vmem>>, vector<1x2048xf32>
    tpu.vector_store %arg7[%c0_12, %c0_13], %11 {strides = array<i32>} : memref<1x2048xf32, #tpu.memory_space<vmem>>, vector<1x2048xf32>,
    %c0_i32_14 = arith.constant 0 : i32
    %13 = arith.cmpi eq, %arg0, %c0_i32_14 : i32
    %14 = arith.extui %13 : i1 to i32
    %c0_i32_15 = arith.constant 0 : i32
    %15 = arith.cmpi ne, %14, %c0_i32_15 : i32
    scf.if %15 {
      %c0_16 = arith.constant 0 : index
      %c0_17 = arith.constant 0 : index
      %16 = vector.load %arg5[%c0_16, %c0_17] : memref<1x2048xf32, #tpu.memory_space<vmem>>, vector<1x2048xf32>
      %17 = vector.shape_cast %16 : vector<1x2048xf32> to vector<1x1x2048xf32>
      %cst = arith.constant dense<0x7F800000> : vector<1xf32>
      %18 = vector.multi_reduction <minimumf>, %17, %cst [1, 2] : vector<1x1x2048xf32> to vector<1xf32>
      %19 = vector.shape_cast %18 : vector<1xf32> to vector<1x1x1xf32>
      %20 = vector.extract %19[0, 0, 0] : f32 from vector<1x1x1xf32>
      %c0_18 = arith.constant 0 : index
      %21 = memref.load %arg3[%c0_18] : memref<1xf32, #tpu.memory_space<smem>>
      memref.store %20, %arg3[%c0_18] : memref<1xf32, #tpu.memory_space<smem>>
      %c0_19 = arith.constant 0 : index
      %c0_20 = arith.constant 0 : index
      %22 = vector.load %arg6[%c0_19, %c0_20] : memref<1x2048xf32, #tpu.memory_space<vmem>>, vector<1x2048xf32>
      %23 = vector.shape_cast %22 : vector<1x2048xf32> to vector<1x1x2048xf32>
      %cst_21 = arith.constant dense<0xFF800000> : vector<1xf32>
      %24 = vector.multi_reduction <maximumf>, %23, %cst_21 [1, 2] : vector<1x1x2048xf32> to vector<1xf32>
      %25 = vector.shape_cast %24 : vector<1xf32> to vector<1x1x1xf32>
      %26 = vector.extract %25[0, 0, 0] : f32 from vector<1x1x1xf32>
      %c0_22 = arith.constant 0 : index
      %27 = memref.load %arg4[%c0_22] : memref<1xf32, #tpu.memory_space<smem>>
      memref.store %26, %arg4[%c0_22] : memref<1xf32, #tpu.memory_space<smem>>
      %c0_23 = arith.constant 0 : index
      %c0_24 = arith.constant 0 : index
      %28 = vector.load %arg7[%c0_23, %c0_24] : memref<1x2048xf32, #tpu.memory_space<vmem>>, vector<1x2048xf32>
      %29 = vector.shape_cast %28 : vector<1x2048xf32> to vector<1x1x2048xf32>
      %cst_25 = arith.constant dense<0.000000e+00> : vector<1xf32>
      %30 = vector.multi_reduction <add>, %29, %cst_25 [1, 2] : vector<1x1x2048xf32> to vector<1xf32>
      %31 = vector.shape_cast %30 : vector<1xf32> to vector<1x1x1xf32>
      %32 = vector.extract %31[0, 0, 0] : f32 from vector<1x1x1xf32>
      %cst_26 = arith.constant 2.048000e+03 : f32
      %33 = arith.divf %32, %cst_26 : f32
      %c0_27 = arith.constant 0 : index
      %34 = memref.load %arg2[%c0_27] : memref<1xf32, #tpu.memory_space<smem>>
      memref.store %33, %arg2[%c0_27] : memref<1xf32, #tpu.memory_space<smem>>
    } else {
    }
    return
  }
  func.func @transform_0(%arg0: i32) -> (i32, i32) {
    %c0_i32 = arith.constant 0 : i32
    %c0_i32_0 = arith.constant 0 : i32
    return %arg0, %c0_i32 : i32, i32
  }
  func.func @transform_1(%arg0: i32) -> i32 {
    %c0_i32 = arith.constant 0 : i32
    %c0_i32_0 = arith.constant 0 : i32
    return %c0_i32 : i32
  }
  func.func @transform_2(%arg0: i32) -> i32 {
    %c0_i32 = arith.constant 0 : i32
    %c0_i32_0 = arith.constant 0 : i32
    return %c0_i32 : i32
  }
  func.func @transform_3(%arg0: i32) -> i32 {
    %c0_i32 = arith.constant 0 : i32
    %c0_i32_0 = arith.constant 0 : i32
    return %c0_i32 : i32
  }
}

</mosaic_0001>

<bundles_post_ra>
// kernel: tpu_custom_call.1
= control target key start
LH: loop header
LB: loop body
LE: loop exit
PB: predicated region body
PF: predicated region fallthrough
CT: control target
= control target key end

     0   :  { %9 = vsyncpa [#allocation6], 0  ;;  %s710_s0 = inlined_call_operand.hbm [shape: f32[1,2048], index: 0, kind: input, shape index: {}]   ;;  %s711_s1 = inlined_call_operand.hbm [shape: f32[1], index: 1, kind: output, shape index: {0}]   ;;  %s712_s2 = inlined_call_operand.hbm [shape: f32[1], index: 2, kind: output, shape index: {1}]   ;;  %s713_s3 = inlined_call_operand.hbm [shape: f32[1], index: 3, kind: output, shape index: {2}]  }
   0x1   :  { %10 = vsyncpa [#allocation7], 0 }
   0x2   :  { %11 = vsyncpa [#allocation10], 0  ;;  %s545_s12 = smov [#allocation5]   ;;  %s487_s16 = scalar_lea.hbm %s710_s0, 256 }
   0x3   :  { %s18_s13 = sshll.u32 %s545_s12, 4  ;;  %p488_p0 = scmp.ne.s32.totalorder %s710_s0, %s487_s16  ;;  %s19_s13 = int_to_ptr.vmem [resolvable:$true] %s18_s13 }
   0x4   :  { %p491_p1 = scmp.lt.u32.totalorder %s487_s16, %s710_s0 }
   0x6   :  { %p493_p2 = pnand %p491_p1, %p488_p0 }
   0x8   :  { %496 = shalt.err (!%p493_p2)
}
   0x9   :  { %s497_s21 = scalar_lea.vmem %s19_s13, 256  ;;  %p502_p4 = scmp.lt.s32.totalorder %s19_s13, %s19_s13 }
   0xa   :  { %p498_p3 = scmp.ne.s32.totalorder %s19_s13, %s497_s21  ;;  %p503_p5 = scmp.lt.s32.totalorder %s497_s21, %s497_s21 }
   0xc   :  { %p504_p6 = por %p503_p5, %p502_p4 }
   0xe   :  { %p505_p7 = pnand %p504_p6, %p498_p3 }
  0x10   :  { %508 = shalt.err (!%p505_p7)
}
  0x11   :  { %21 = dma.hbm_to_vmem [thread:$0]  %s710_s0, 256, %s19_s13, [#allocation6]  }
  0x12   :  { %539 = dma.done.wait [#allocation6], 256  }
  0x13   :  { %540 = vsyncadd [#allocation6], 4294967040  ;;  %v62_v0 = vlaneseq  ;;  %v35_v10 = vld [vmem:[#allocation5] sm:$0xff]  ;;  %v36_v11 = vld [vmem:[#allocation5 + $0x8] sm:$0xff]  ;;  %vm142_vm0 = vcmask 1040384   ;;  %s509_s26 = scalar_lea.hbm %s712_s2, 16 }
  0x14   :  { %p510_p8 = scmp.ne.s32.totalorder %s712_s2, %s509_s26  ;;  %p513_p9 = scmp.lt.u32.totalorder %s509_s26, %s712_s2 }
  0x15   :  { %v63_v1 = vshrl.u32 %v62_v0, 7 }
  0x16   :  { %p515_p10 = pnand %p513_p9, %p510_p8 }
  0x17   :  { %v64_v2 = vsub.s32 0, %v63_v1  ;;  %v68_v3 = vsub.s32 1, %v63_v1  ;;  %v72_v4 = vsub.s32 2, %v63_v1  ;;  %v76_v5 = vsub.s32 3, %v63_v1 }
  0x18   :  { %v80_v6 = vsub.s32 4, %v63_v1  ;;  %v84_v7 = vsub.s32 5, %v63_v1  ;;  %v88_v8 = vsub.s32 6, %v63_v1  ;;  %v92_v9 = vsub.s32 7, %v63_v1 }
  0x19   :  { %v65_v12 = vrot.slane %v35_v10, %v64_v2  ;;  %v69_v13 = vrot.slane %v35_v10, %v68_v3  ;;  %v73_v14 = vrot.slane %v35_v10, %v72_v4  ;;  %v77_v15 = vrot.slane %v35_v10, %v76_v5 }
  0x1a   :  { %v81_v16 = vrot.slane %v35_v10, %v80_v6  ;;  %v85_v17 = vrot.slane %v35_v10, %v84_v7  ;;  %v89_v18 = vrot.slane %v35_v10, %v88_v8  ;;  %v581_v19 = vrot.slane %v35_v10, %v92_v9 }
  0x1b   :  { %v583_v20 = vrot.slane %v36_v11, %v64_v2  ;;  %v585_v21 = vrot.slane %v36_v11, %v68_v3  ;;  %v587_v22 = vrot.slane %v36_v11, %v72_v4  ;;  %v589_v23 = vrot.slane %v36_v11, %v76_v5 }
  0x1c   :  { %v591_v24 = vrot.slane %v36_v11, %v80_v6  ;;  %v593_v25 = vrot.slane %v36_v11, %v84_v7  ;;  %v595_v26 = vrot.slane %v36_v11, %v88_v8  ;;  %v597_v27 = vrot.slane %v36_v11, %v92_v9 }
  0x1d   :  { %v143_v28 = vsel %vm142_vm0, %v65_v12, inf  ;;  %v144_v29 = vsel %vm142_vm0, %v69_v13, inf  ;;  %v145_v30 = vsel %vm142_vm0, %v73_v14, inf  ;;  %v146_v31 = vsel %vm142_vm0, %v77_v15, inf }
  0x1e   :  { %v147_v32 = vsel %vm142_vm0, %v81_v16, inf  ;;  %v149_v33 = vsel %vm142_vm0, %v85_v17, inf  ;;  %v151_v34 = vsel %vm142_vm0, %v89_v18, inf  ;;  %v153_v35 = vsel %vm142_vm0, %v581_v19, inf }
  0x1f   :  { %v148_v36 = vmin.f32 %v143_v28, %v147_v32  ;;  %v150_v37 = vmin.f32 %v144_v29, %v149_v33  ;;  %v152_v38 = vmin.f32 %v145_v30, %v151_v34  ;;  %v154_v39 = vmin.f32 %v146_v31, %v153_v35 }
  0x20   :  { %v155_v40 = vsel %vm142_vm0, %v583_v20, inf  ;;  %v157_v41 = vsel %vm142_vm0, %v585_v21, inf  ;;  %v159_v42 = vsel %vm142_vm0, %v587_v22, inf  ;;  %v161_v43 = vsel %vm142_vm0, %v589_v23, inf }
  0x21   :  { %v156_v44 = vmin.f32 %v148_v36, %v155_v40  ;;  %v158_v45 = vmin.f32 %v150_v37, %v157_v41  ;;  %v160_v46 = vmin.f32 %v152_v38, %v159_v42  ;;  %v162_v47 = vmin.f32 %v154_v39, %v161_v43 }
  0x22   :  { %v163_v48 = vsel %vm142_vm0, %v591_v24, inf  ;;  %v165_v49 = vsel %vm142_vm0, %v593_v25, inf  ;;  %v167_v50 = vsel %vm142_vm0, %v595_v26, inf  ;;  %v169_v51 = vsel %vm142_vm0, %v597_v27, inf }
  0x23   :  { %v164_v52 = vmin.f32 %v156_v44, %v163_v48  ;;  %v166_v53 = vmin.f32 %v158_v45, %v165_v49  ;;  %v168_v54 = vmin.f32 %v160_v46, %v167_v50  ;;  %v170_v55 = vmin.f32 %v162_v47, %v169_v51 }
  0x24   :  { %v395_v56 = vsel %vm142_vm0, %v65_v12, 0.0  ;;  %v396_v57 = vsel %vm142_vm0, %v69_v13, 0.0  ;;  %v398_v58 = vsel %vm142_vm0, %v73_v14, 0.0  ;;  %v400_v59 = vsel %vm142_vm0, %v77_v15, 0.0 }
  0x25   :  { %v171_v60 = vmin.f32 %v164_v52, %v166_v53  ;;  %v172_v61 = vmin.f32 %v168_v54, %v170_v55  ;;  %v397_v62 = vadd.f32 %v396_v57, %v395_v56  ;;  %v402_v63 = vsel %vm142_vm0, %v81_v16, 0.0 }
  0x26   :  { %v404_v0 = vsel %vm142_vm0, %v85_v17, 0.0  ;;  %v406_v1 = vsel %vm142_vm0, %v89_v18, 0.0  ;;  %v269_v2 = vsel %vm142_vm0, %v65_v12, -inf  ;;  %v270_v3 = vsel %vm142_vm0, %v69_v13, -inf }
  0x27   :  { %v173_v4 = vmin.f32 %v171_v60, %v172_v61  ;;  %v399_v5 = vadd.f32 %v398_v58, %v397_v62  ;;  %v271_v6 = vsel %vm142_vm0, %v73_v14, -inf  ;;  %v272_v7 = vsel %vm142_vm0, %v77_v15, -inf }
  0x28   :  { %v273_v8 = vsel %vm142_vm0, %v81_v16, -inf  ;;  %v275_v9 = vsel %vm142_vm0, %v85_v17, -inf  ;;  %v277_v10 = vsel %vm142_vm0, %v89_v18, -inf  ;;  %v279_v11 = vsel %vm142_vm0, %v581_v19, -inf }
  0x29   :  { %v401_v28 = vadd.f32 %v400_v59, %v399_v5  ;;  %174 = vmin.xlane.f32.xlu0 %v173_v4  ;;  %v274_v12 = vmax.f32 %v269_v2, %v273_v8  ;;  %v276_v29 = vmax.f32 %v270_v3, %v275_v9  ;;  %v278_v13 = vmax.f32 %v271_v6, %v277_v10 }
  0x2a   :  { %v280_v30 = vmax.f32 %v272_v7, %v279_v11  ;;  %v281_v14 = vsel %vm142_vm0, %v583_v20, -inf  ;;  %v283_v15 = vsel %vm142_vm0, %v585_v21, -inf  ;;  %v285_v16 = vsel %vm142_vm0, %v587_v22, -inf }
  0x2b   :  { %v403_v17 = vadd.f32 %v402_v63, %v401_v28  ;;  %v282_v18 = vmax.f32 %v274_v12, %v281_v14  ;;  %v284_v31 = vmax.f32 %v276_v29, %v283_v15  ;;  %v286_v32 = vmax.f32 %v278_v13, %v285_v16 }
  0x2c   :  { %v287_v33 = vsel %vm142_vm0, %v589_v23, -inf  ;;  %v289_v34 = vsel %vm142_vm0, %v591_v24, -inf  ;;  %v291_v35 = vsel %vm142_vm0, %v593_v25, -inf  ;;  %v293_v36 = vsel %vm142_vm0, %v595_v26, -inf }
  0x2d   :  { %v405_v37 = vadd.f32 %v404_v0, %v403_v17  ;;  %v288_v38 = vmax.f32 %v280_v30, %v287_v33  ;;  %v290_v39 = vmax.f32 %v282_v18, %v289_v34  ;;  %v292_v40 = vmax.f32 %v284_v31, %v291_v35 }
  0x2e   :  { %v294_v41 = vmax.f32 %v286_v32, %v293_v36  ;;  %v295_v42 = vsel %vm142_vm0, %v597_v27, -inf  ;;  %v408_v43 = vsel %vm142_vm0, %v581_v19, 0.0  ;;  %v410_v47 = vsel %vm142_vm0, %v583_v20, 0.0 }
  0x2f   :  { %v296_v44 = vmax.f32 %v288_v38, %v295_v42  ;;  %v297_v45 = vmax.f32 %v290_v39, %v292_v40  ;;  %v407_v46 = vadd.f32 %v406_v1, %v405_v37  ;;  %v412_v50 = vsel %vm142_vm0, %v585_v21, 0.0 }
  0x30   :  { %v414_v53 = vsel %vm142_vm0, %v587_v22, 0.0  ;;  %v416_v19 = vsel %vm142_vm0, %v589_v23, 0.0  ;;  %v418_v56 = vsel %vm142_vm0, %v591_v24, 0.0  ;;  %v420_v57 = vsel %vm142_vm0, %v593_v25, 0.0 }
  0x31   :  { %v298_v48 = vmax.f32 %v294_v41, %v296_v44  ;;  %v409_v49 = vadd.f32 %v408_v43, %v407_v46  ;;  %v422_v21 = vsel %vm142_vm0, %v595_v26, 0.0  ;;  %v424_v22 = vsel %vm142_vm0, %v597_v27, 0.0 }
  0x33   :  { %v299_v51 = vmax.f32 %v297_v45, %v298_v48  ;;  %v411_v52 = vadd.f32 %v410_v47, %v409_v49 }
  0x35   :  { %300 = vmax.xlane.f32.xlu0 %v299_v51  ;;  %v413_v54 = vadd.f32 %v412_v50, %v411_v52 }
  0x37   :  { %v415_v55 = vadd.f32 %v414_v53, %v413_v54 }
  0x39   :  { %v417_v20 = vadd.f32 %v416_v19, %v415_v55 }
  0x3b   :  { %v419_v58 = vadd.f32 %v418_v56, %v417_v20 }
  0x3d   :  { %v421_v59 = vadd.f32 %v420_v57, %v419_v58 }
  0x3f   :  { %v423_v60 = vadd.f32 %v422_v21, %v421_v59 }
  0x41   :  { %v425_v61 = vadd.f32 %v424_v22, %v423_v60 }
  0x43   :  { %426 = vadd.xlane.f32.xlu1 %v425_v61 }
  0xb6   :  { %v175_v23 = vpop.xlane.xlu0 %174 }
  0xb7   :  { %v176_v62 = vrot.slane %v175_v23, 4 }
  0xb9   :  { %v177_v63 = vmin.f32 %v175_v23, %v176_v62 }
  0xbb   :  { %v178_v0 = vrot.slane %v177_v63, 2 }
  0xbd   :  { %v179_v24 = vmin.f32 %v177_v63, %v178_v0 }
  0xbf   :  { %v180_v1 = vrot.slane %v179_v24, 1 }
  0xc1   :  { %v181_v2 = vmin.f32 %v179_v24, %v180_v1 }
  0xc2   :  { %v301_v3 = vpop.xlane.xlu0 %300 }
  0xc3   :  { %v302_v25 = vrot.slane %v301_v3, 4  ;;  %477 = vpush %v181_v2 }
  0xc5   :  { %v303_v4 = vmax.f32 %v301_v3, %v302_v25 }
  0xc7   :  { %v304_v5 = vrot.slane %v303_v4, 2 }
  0xc9   :  { %v305_v26 = vmax.f32 %v303_v4, %v304_v5 }
  0xcb   :  { %v306_v6 = vrot.slane %v305_v26, 1 }
  0xcd   :  { %v307_v7 = vmax.f32 %v305_v26, %v306_v6 }
  0xcf   :  { %479 = vpush %v307_v7 }
  0xd0   :  { %v427_v27 = vpop.xlane.xlu1 %426 }
  0xd1   :  { %v428_v8 = vrot.slane %v427_v27, 4 }
  0xd3   :  { %v429_v9 = vadd.f32 %v428_v8, %v427_v27 }
  0xd5   :  { %v430_v10 = vrot.slane %v429_v9, 2 }
  0xd7   :  { %v431_v11 = vadd.f32 %v430_v10, %v429_v9 }
  0xd9   :  { %v432_v28 = vrot.slane %v431_v11, 1 }
  0xdb   :  { %v433_v12 = vadd.f32 %v432_v28, %v431_v11 }
  0xdd   :  { %481 = vpush %v433_v12 }
  0xf4   :  { %s478_s0 = spop %477 }
  0xf5   :  { %184 = sst [smem:[#allocation9]] %s478_s0 }
  0xf6   :  { %518 = shalt.err (!%p515_p10)
}
  0xf7   :  { %s546_s4 = smov [#allocation9]   ;;  %s519_s10 = scalar_lea.hbm %s713_s3, 16 }
  0xf8   :  { %455 = dma.smem_to_hbm %s546_s4, 16, %s712_s2, [#allocation10]  }
  0xf9   :  { %p520_p11 = scmp.ne.s32.totalorder %s713_s3, %s519_s10  ;;  %p523_p12 = scmp.lt.u32.totalorder %s519_s10, %s713_s3 }
  0xfb   :  { %p525_p13 = pnand %p523_p12, %p520_p11 }
 0x100   :  { %s480_s7 = spop %479 }
 0x101   :  { %310 = sst [smem:[#allocation11]] %s480_s7 }
 0x102   :  { %528 = shalt.err (!%p525_p13)
}
 0x103   :  { %s547_s15 = smov [#allocation11]   ;;  %s529_s21 = scalar_lea.hbm %s711_s1, 16 }
 0x104   :  { %463 = dma.smem_to_hbm %s547_s15, 16, %s713_s3, [#allocation10]  }
 0x105   :  { %p530_p0 = scmp.ne.s32.totalorder %s711_s1, %s529_s21  ;;  %p533_p1 = scmp.lt.u32.totalorder %s529_s21, %s711_s1 }
 0x107   :  { %p535_p2 = pnand %p533_p1, %p530_p0 }
 0x10e   :  { %s482_s2 = spop %481 }
 0x10f   :  { %s437_s18 = smul.f32 0.00048828125, %s482_s2 }
 0x111   :  { %439 = sst [smem:[#allocation8]] %s437_s18 }
 0x112   :  { %538 = shalt.err (!%p535_p2)
}
 0x113   :  { %s548_s25 = smov [#allocation8]  }
 0x114   :  { %447 = dma.smem_to_hbm %s548_s25, 16, %s711_s1, [#allocation7]  }
 0x115   :  { %541 = dma.done.wait [#allocation7], 16  }
 0x116   :  { %542 = vsyncadd [#allocation7], 4294967280 }
 0x117   :  { %543 = dma.done.wait [#allocation10], 32  }
 0x118   :  { %544 = vsyncadd [#allocation10], 4294967264 }
 0x119   :  { %473 = sfence }
 0x11a   :  { %474 = vsyncpa [#allocation6], 1 }
 0x11b   :  { %475 = vsyncpa [#allocation7], 1 }
 0x11c   :  { %476 = vsyncpa [#allocation10], 1 }

</bundles_post_ra>
